<compile_context>
chip_gen: v7x
topology: tpu7x:2x2x1
jax: 0.10.0
libtpu: 0.0.40
codegen_flags: <defaults>
</compile_context>

<pallas_src>
import math

import numpy as np

import jax
import jax.numpy as jnp
from jax import lax
from jax.experimental import pallas as pl
from jax.experimental.pallas import tpu as pltpu

C_CLIP = 10.0  # self.C in the PyTorch module


# ---------------------------------------------------------------------------
# Kernel bodies
# ---------------------------------------------------------------------------
def _scores_and_mask(idx_ref, x_ref, xfirst_ref, wq_ref, wk_ref, adj_ref, vis_ref):
    """Shared front end, fully fused.

    Returns (u, add_mask), both [1, N] f32:
      u        = (features_concat @ Wq) @ (x @ Wk)^T / sqrt(H)   (re-associated)
      add_mask = visited_mask + adj[previous_node]
    """
    n_nodes, hidden_dim = x_ref.shape
    inv_sqrt_d = 1.0 / math.sqrt(hidden_dim)

    start = idx_ref[0]          # starting_node
    prev = idx_ref[1]           # previous_node
    use_x_first = idx_ref[2]    # 1 if X (previous layer output) was provided

    x = x_ref[...]                                                     # [N, H]

    # Row selection as exact one-hot matmuls (0/1 weights -> exact gather),
    # avoids dynamic sublane slicing and any XLA-side gather ops.
    lane_ids = lax.broadcasted_iota(jnp.int32, (1, n_nodes), 1)        # [1, N]
    oh_start = (lane_ids == start).astype(jnp.float32)
    oh_prev = (lane_ids == prev).astype(jnp.float32)
    x_start = jnp.dot(oh_start, x, preferred_element_type=jnp.float32)  # [1, H]
    x_prev = jnp.dot(oh_prev, x, preferred_element_type=jnp.float32)    # [1, H]

    # first = X if provided else mean over nodes (exact 0/1 blend).
    x_mean = jnp.sum(x, axis=0, keepdims=True) * (1.0 / n_nodes)        # [1, H]
    sel = (use_x_first != 0).astype(jnp.float32)
    first = sel * xfirst_ref[...] + (1.0 - sel) * x_mean                # [1, H]

    # q = concat([first, x_start, x_prev]) @ Wq, with Wq split into 3 HxH
    # blocks so no lane-dim concat is needed.
    h = hidden_dim
    q = (jnp.dot(first, wq_ref[pl.ds(0, h), :],
                 preferred_element_type=jnp.float32)
         + jnp.dot(x_start, wq_ref[pl.ds(h, h), :],
                   preferred_element_type=jnp.float32)
         + jnp.dot(x_prev, wq_ref[pl.ds(2 * h, h), :],
                   preferred_element_type=jnp.float32))                 # [1, H]

    # u = q @ (x @ Wk)^T  ==  (q @ Wk^T) @ x^T.  Both steps use last-dim
    # contractions (no K matrix, no transpose materialized).
    s = lax.dot_general(q, wk_ref[...], (((1,), (1,)), ((), ())),
                        preferred_element_type=jnp.float32)             # [1, H]
    u = lax.dot_general(s, x, (((1,), (1,)), ((), ())),
                        preferred_element_type=jnp.float32) * inv_sqrt_d  # [1, N]

    # Combined additive mask: visited (1 / 0) + adjacency row of previous node.
    adj_row = jnp.dot(oh_prev, adj_ref[...],
                      preferred_element_type=jnp.float32)               # [1, N]
    add_mask = vis_ref[...] + adj_row                                   # [1, N]
    return u, add_mask


def _decoder_kernel_mid(idx_ref, x_ref, xfirst_ref, wq_ref, wk_ref, wv_ref,
                        wo_ref, adj_ref, vis_ref, out_ref):
    """Non-final layer: out = ((softmax(u + mask) @ x) @ Wv) @ Wo  -> [1, H]."""
    u, add_mask = _scores_and_mask(idx_ref, x_ref, xfirst_ref, wq_ref, wk_ref,
                                   adj_ref, vis_ref)
    logits = u + add_mask                                               # [1, N]
    m = jnp.max(logits, axis=-1, keepdims=True)
    e = jnp.exp(logits - m)
    p = e * pl.reciprocal(jnp.sum(e, axis=-1, keepdims=True), approx=True)

    # h = softmax(u) @ (x @ Wv)  ==  (softmax(u) @ x) @ Wv   (re-associated)
    t = jnp.dot(p, x_ref[...], preferred_element_type=jnp.float32)      # [1, H]
    hvec = jnp.dot(t, wv_ref[...], preferred_element_type=jnp.float32)  # [1, H]
    out_ref[...] = jnp.dot(hvec, wo_ref[...],
                           preferred_element_type=jnp.float32)          # [1, H]


def _decoder_kernel_final(idx_ref, x_ref, xfirst_ref, wq_ref, wk_ref,
                          adj_ref, vis_ref, out_ref):
    """Final layer: out = softmax(C * tanh(u) + mask)  -> [1, N]."""
    u, add_mask = _scores_and_mask(idx_ref, x_ref, xfirst_ref, wq_ref, wk_ref,
                                   adj_ref, vis_ref)
    logits = C_CLIP * jnp.tanh(u) + add_mask                            # [1, N]
    m = jnp.max(logits, axis=-1, keepdims=True)
    e = jnp.exp(logits - m)
    out_ref[...] = e * pl.reciprocal(jnp.sum(e, axis=-1, keepdims=True),
                                     approx=True)                       # [1, N]


# ---------------------------------------------------------------------------
# Wrapper
# ---------------------------------------------------------------------------
def decoder_layer_forward(params, x, X, starting_node, previous_node,
                          nodes_visited, adj, *, final_layer):
    """JAX/Pallas equivalent of Decoder_Layer.forward.

    x:   [n_nodes, hidden_dim] float32
    X:   None or [hidden_dim] float32
    adj: [n_nodes, n_nodes]
    Returns: [n_nodes] if final_layer else [hidden_dim]
    """
    n_nodes, hidden_dim = x.shape
    wq, wk, wv, wo = params["Wq"], params["Wk"], params["Wv"], params["Wo"]

    # Host-side prep (numpy): no per-node XLA scatter ops, no retrace when
    # len(nodes_visited) changes.
    vis_np = np.ones((1, n_nodes), dtype=np.float32)
    if len(nodes_visited):
        vis_np[0, np.asarray(list(nodes_visited), dtype=np.int64)] = 0.0
    vis = jnp.asarray(vis_np)

    use_x_first = 0 if X is None else 1
    idx = jnp.asarray(np.array([starting_node, previous_node, use_x_first],
                               dtype=np.int32))
    xfirst = (jnp.zeros((1, hidden_dim), jnp.float32) if X is None
              else jnp.asarray(X, jnp.float32).reshape(1, hidden_dim))
    adj_f32 = jnp.asarray(adj, jnp.float32)

    smem_spec = pl.BlockSpec(memory_space=pltpu.MemorySpace.SMEM)
    vmem_spec = pl.BlockSpec(memory_space=pltpu.MemorySpace.VMEM)

    if final_layer:
        out = pl.pallas_call(
            _decoder_kernel_final,
            out_shape=jax.ShapeDtypeStruct((1, n_nodes), jnp.float32),
            in_specs=[smem_spec] + [vmem_spec] * 6,
            out_specs=vmem_spec,
        )(idx, x, xfirst, wq, wk, adj_f32, vis)
    else:
        out = pl.pallas_call(
            _decoder_kernel_mid,
            out_shape=jax.ShapeDtypeStruct((1, hidden_dim), jnp.float32),
            in_specs=[smem_spec] + [vmem_spec] * 8,
            out_specs=vmem_spec,
        )(idx, x, xfirst, wq, wk, wv, wo, adj_f32, vis)

    return out.reshape(-1)


def init_params(key, hidden_dim):
    """Deterministic init matching nn.Parameter.uniform_(-1/sqrt(H), 1/sqrt(H))."""
    bound = 1.0 / math.sqrt(hidden_dim)
    k1, k2, k3, k4 = jax.random.split(key, 4)
    u = lambda k, shape: jax.random.uniform(k, shape, jnp.float32, -bound, bound)
    return {
        "Wq": u(k1, (3 * hidden_dim, hidden_dim)),
        "Wk": u(k2, (hidden_dim, hidden_dim)),
        "Wv": u(k3, (hidden_dim, hidden_dim)),
        "Wo": u(k4, (hidden_dim, hidden_dim)),
    }


# ---------------------------------------------------------------------------
# Pure-JAX reference (direct transcription of the PyTorch forward)
# ---------------------------------------------------------------------------
def _reference_forward(params, x, X, starting_node, previous_node,
                       nodes_visited, adj, *, final_layer):
    n_nodes, hidden_dim = x.shape
    first = jnp.mean(x, axis=0) if X is None else X
    fc = jnp.concatenate([first, x[starting_node], x[previous_node]])
    q = fc @ params["Wq"]
    k = x @ params["Wk"]
    v = x @ params["Wv"]
    u = (q @ k.T) / math.sqrt(hidden_dim)
    mask1 = np.ones((n_nodes,), np.float32)
    for node in nodes_visited:
        mask1[node] = 0.0
    mask1 = jnp.asarray(mask1)
    mask2 = jnp.asarray(adj, jnp.float32)[previous_node]
    if final_layer:
        return jax.nn.softmax(C_CLIP * jnp.tanh(u) + mask1 + mask2)
    u_ = jax.nn.softmax(u + mask1 + mask2)
    return (u_ @ v) @ params["Wo"]


if __name__ == "__main__":
    n_nodes = 8
    hidden_dim = 32

    key = jax.random.PRNGKey(0)
    k_params, k_x, k_adj, k_X = jax.random.split(key, 4)

    params = init_params(k_params, hidden_dim)
    x = jax.random.normal(k_x, (n_nodes, hidden_dim), jnp.float32)
    adj = (jax.random.uniform(k_adj, (n_nodes, n_nodes)) > 0.5).astype(jnp.float32)
    X_prev = jax.random.normal(k_X, (hidden_dim,), jnp.float32)

    starting_node = 0
    previous_node = 3
    nodes_visited = [0, 3]

    # First iteration style (X=None), intermediate layer -> [hidden_dim]
    out_mid = decoder_layer_forward(params, x, None, starting_node, previous_node,
                                    nodes_visited, adj, final_layer=False)
    # Subsequent iteration (X given), final layer -> [n_nodes] probability dist.
    out_final = decoder_layer_forward(params, x, X_prev, starting_node, previous_node,
                                      nodes_visited, adj, final_layer=True)

    jax.block_until_ready(out_mid)
    jax.block_until_ready(out_final)

    ref_mid = _reference_forward(params, x, None, starting_node, previous_node,
                                 nodes_visited, adj, final_layer=False)
    ref_final = _reference_forward(params, x, X_prev, starting_node, previous_node,
                                   nodes_visited, adj, final_layer=True)

    assert out_mid.shape == (hidden_dim,)
    assert out_final.shape == (n_nodes,)
    # Tolerances account for the EUP approx reciprocal in the softmax and the
    # (mathematically exact) matmul re-association.
    assert jnp.allclose(out_mid, ref_mid, rtol=1e-2, atol=1e-2)
    assert jnp.allclose(out_final, ref_final, rtol=1e-2, atol=1e-2)
    assert jnp.isclose(jnp.sum(out_final), 1.0, atol=5e-3)

    print("KERNEL_OK")
</pallas_src>

<mosaic_0001>
module attributes {stable_mosaic.version = 11 : i64} {
  func.func @_decoder_kernel_mid(%arg0: memref<3xi32, #tpu.memory_space<smem>>, %arg1: memref<8x32xf32, #tpu.memory_space<vmem>>, %arg2: memref<1x32xf32, #tpu.memory_space<vmem>>, %arg3: memref<96x32xf32, #tpu.memory_space<vmem>>, %arg4: memref<32x32xf32, #tpu.memory_space<vmem>>, %arg5: memref<32x32xf32, #tpu.memory_space<vmem>>, %arg6: memref<32x32xf32, #tpu.memory_space<vmem>>, %arg7: memref<8x8xf32, #tpu.memory_space<vmem>>, %arg8: memref<1x8xf32, #tpu.memory_space<vmem>>, %arg9: memref<1x32xf32, #tpu.memory_space<vmem>>) attributes {dimension_semantics = [], scalar_prefetch = 0 : i64, scratch_operands = 0 : i64, tpu.core_type = #tpu.core_type<tc>} {
    %c0 = arith.constant 0 : index
    %0 = memref.load %arg0[%c0] : memref<3xi32, #tpu.memory_space<smem>>
    %c1 = arith.constant 1 : index
    %1 = memref.load %arg0[%c1] : memref<3xi32, #tpu.memory_space<smem>>
    %c2 = arith.constant 2 : index
    %2 = memref.load %arg0[%c2] : memref<3xi32, #tpu.memory_space<smem>>
    %c0_0 = arith.constant 0 : index
    %c0_1 = arith.constant 0 : index
    %3 = vector.load %arg1[%c0_0, %c0_1] : memref<8x32xf32, #tpu.memory_space<vmem>>, vector<8x32xf32>
    %4 = tpu.iota {dimensions = array<i32: 1>} : vector<1x8xi32>
    %5 = vector.broadcast %0 : i32 to vector<1x8xi32>
    %6 = arith.cmpi eq, %4, %5 : vector<1x8xi32>
    %7 = arith.extui %6 : vector<1x8xi1> to vector<1x8xi32>
    %8 = arith.sitofp %7 : vector<1x8xi32> to vector<1x8xf32>
    %9 = vector.broadcast %1 : i32 to vector<1x8xi32>
    %10 = arith.cmpi eq, %4, %9 : vector<1x8xi32>
    %11 = arith.extui %10 : vector<1x8xi1> to vector<1x8xi32>
    %12 = arith.sitofp %11 : vector<1x8xi32> to vector<1x8xf32>
    %cst = arith.constant dense<0.000000e+00> : vector<1x32xf32>
    %13 = tpu.matmul %8, %3, %cst {dimension_numbers = #tpu.dot_dimension_numbers<[1], [0], [0], [1], [0, 0, 1, 1], [], []>} : vector<1x8xf32>, vector<8x32xf32>, vector<1x32xf32> -> vector<1x32xf32>
    %cst_2 = arith.constant dense<0.000000e+00> : vector<1x32xf32>
    %14 = tpu.matmul %12, %3, %cst_2 {dimension_numbers = #tpu.dot_dimension_numbers<[1], [0], [0], [1], [0, 0, 1, 1], [], []>} : vector<1x8xf32>, vector<8x32xf32>, vector<1x32xf32> -> vector<1x32xf32>
    %cst_3 = arith.constant dense<0.000000e+00> : vector<32xf32>
    %15 = vector.multi_reduction <add>, %3, %cst_3 [0] : vector<8x32xf32> to vector<32xf32>
    %16 = vector.shape_cast %15 : vector<32xf32> to vector<1x32xf32>
    %cst_4 = arith.constant 1.250000e-01 : f32
    %17 = vector.broadcast %cst_4 : f32 to vector<1x32xf32>
    %18 = arith.mulf %16, %17 : vector<1x32xf32>
    %c0_i32 = arith.constant 0 : i32
    %19 = arith.cmpi ne, %2, %c0_i32 : i32
    %20 = arith.extui %19 : i1 to i32
    %21 = arith.sitofp %20 : i32 to f32
    %c0_5 = arith.constant 0 : index
    %c0_6 = arith.constant 0 : index
    %22 = vector.load %arg2[%c0_5, %c0_6] : memref<1x32xf32, #tpu.memory_space<vmem>>, vector<1x32xf32>
    %23 = vector.broadcast %21 : f32 to vector<1x32xf32>
    %24 = arith.mulf %23, %22 : vector<1x32xf32>
    %cst_7 = arith.constant 1.000000e+00 : f32
    %25 = arith.subf %cst_7, %21 : f32
    %26 = vector.broadcast %25 : f32 to vector<1x32xf32>
    %27 = arith.mulf %26, %18 : vector<1x32xf32>
    %28 = arith.addf %24, %27 : vector<1x32xf32>
    %c0_8 = arith.constant 0 : index
    %c0_9 = arith.constant 0 : index
    %29 = vector.load %arg3[%c0_8, %c0_9] : memref<96x32xf32, #tpu.memory_space<vmem>>, vector<32x32xf32>
    %cst_10 = arith.constant dense<0.000000e+00> : vector<1x32xf32>
    %30 = tpu.matmul %28, %29, %cst_10 {dimension_numbers = #tpu.dot_dimension_numbers<[1], [0], [0], [1], [0, 0, 1, 1], [], []>} : vector<1x32xf32>, vector<32x32xf32>, vector<1x32xf32> -> vector<1x32xf32>
    %c32 = arith.constant 32 : index
    %c0_11 = arith.constant 0 : index
    %31 = vector.load %arg3[%c32, %c0_11] : memref<96x32xf32, #tpu.memory_space<vmem>>, vector<32x32xf32>
    %cst_12 = arith.constant dense<0.000000e+00> : vector<1x32xf32>
    %32 = tpu.matmul %13, %31, %cst_12 {dimension_numbers = #tpu.dot_dimension_numbers<[1], [0], [0], [1], [0, 0, 1, 1], [], []>} : vector<1x32xf32>, vector<32x32xf32>, vector<1x32xf32> -> vector<1x32xf32>
    %33 = arith.addf %30, %32 : vector<1x32xf32>
    %c64 = arith.constant 64 : index
    %c0_13 = arith.constant 0 : index
    %34 = vector.load %arg3[%c64, %c0_13] : memref<96x32xf32, #tpu.memory_space<vmem>>, vector<32x32xf32>
    %cst_14 = arith.constant dense<0.000000e+00> : vector<1x32xf32>
    %35 = tpu.matmul %14, %34, %cst_14 {dimension_numbers = #tpu.dot_dimension_numbers<[1], [0], [0], [1], [0, 0, 1, 1], [], []>} : vector<1x32xf32>, vector<32x32xf32>, vector<1x32xf32> -> vector<1x32xf32>
    %36 = arith.addf %33, %35 : vector<1x32xf32>
    %c0_15 = arith.constant 0 : index
    %c0_16 = arith.constant 0 : index
    %37 = vector.load %arg4[%c0_15, %c0_16] : memref<32x32xf32, #tpu.memory_space<vmem>>, vector<32x32xf32>
    %cst_17 = arith.constant dense<0.000000e+00> : vector<1x32xf32>
    %38 = tpu.matmul %36, %37, %cst_17 {dimension_numbers = #tpu.dot_dimension_numbers<[1], [1], [0], [0], [0, 0, 1, 0], [], []>} : vector<1x32xf32>, vector<32x32xf32>, vector<1x32xf32> -> vector<1x32xf32>
    %cst_18 = arith.constant dense<0.000000e+00> : vector<1x8xf32>
    %39 = tpu.matmul %38, %3, %cst_18 {dimension_numbers = #tpu.dot_dimension_numbers<[1], [1], [0], [0], [0, 0, 1, 0], [], []>} : vector<1x32xf32>, vector<8x32xf32>, vector<1x8xf32> -> vector<1x8xf32>
    %cst_19 = arith.constant 0.176776692 : f32
    %40 = vector.broadcast %cst_19 : f32 to vector<1x8xf32>
    %41 = arith.mulf %39, %40 : vector<1x8xf32>
    %c0_20 = arith.constant 0 : index
    %c0_21 = arith.constant 0 : index
    %42 = vector.load %arg7[%c0_20, %c0_21] : memref<8x8xf32, #tpu.memory_space<vmem>>, vector<8x8xf32>
    %cst_22 = arith.constant dense<0.000000e+00> : vector<1x8xf32>
    %43 = tpu.matmul %12, %42, %cst_22 {dimension_numbers = #tpu.dot_dimension_numbers<[1], [0], [0], [1], [0, 0, 1, 1], [], []>} : vector<1x8xf32>, vector<8x8xf32>, vector<1x8xf32> -> vector<1x8xf32>
    %c0_23 = arith.constant 0 : index
    %c0_24 = arith.constant 0 : index
    %44 = vector.load %arg8[%c0_23, %c0_24] : memref<1x8xf32, #tpu.memory_space<vmem>>, vector<1x8xf32>
    %45 = arith.addf %44, %43 : vector<1x8xf32>
    %46 = arith.addf %41, %45 : vector<1x8xf32>
    %cst_25 = arith.constant dense<0xFF800000> : vector<1xf32>
    %47 = vector.multi_reduction <maximumf>, %46, %cst_25 [1] : vector<1x8xf32> to vector<1xf32>
    %48 = vector.shape_cast %47 : vector<1xf32> to vector<1x1xf32>
    %49 = vector.broadcast %48 : vector<1x1xf32> to vector<1x8xf32>
    %50 = arith.subf %46, %49 : vector<1x8xf32>
    %51 = math.exp %50 : vector<1x8xf32>
    %cst_26 = arith.constant dense<0.000000e+00> : vector<1xf32>
    %52 = vector.multi_reduction <add>, %51, %cst_26 [1] : vector<1x8xf32> to vector<1xf32>
    %53 = vector.shape_cast %52 : vector<1xf32> to vector<1x1xf32>
    %54 = tpu.reciprocal %53 {approx = true} : vector<1x1xf32> -> vector<1x1xf32>
    %55 = vector.broadcast %54 : vector<1x1xf32> to vector<1x8xf32>
    %56 = arith.mulf %51, %55 : vector<1x8xf32>
    %c0_27 = arith.constant 0 : index
    %c0_28 = arith.constant 0 : index
    %57 = vector.load %arg1[%c0_27, %c0_28] : memref<8x32xf32, #tpu.memory_space<vmem>>, vector<8x32xf32>
    %cst_29 = arith.constant dense<0.000000e+00> : vector<1x32xf32>
    %58 = tpu.matmul %56, %57, %cst_29 {dimension_numbers = #tpu.dot_dimension_numbers<[1], [0], [0], [1], [0, 0, 1, 1], [], []>} : vector<1x8xf32>, vector<8x32xf32>, vector<1x32xf32> -> vector<1x32xf32>
    %c0_30 = arith.constant 0 : index
    %c0_31 = arith.constant 0 : index
    %59 = vector.load %arg5[%c0_30, %c0_31] : memref<32x32xf32, #tpu.memory_space<vmem>>, vector<32x32xf32>
    %cst_32 = arith.constant dense<0.000000e+00> : vector<1x32xf32>
    %60 = tpu.matmul %58, %59, %cst_32 {dimension_numbers = #tpu.dot_dimension_numbers<[1], [0], [0], [1], [0, 0, 1, 1], [], []>} : vector<1x32xf32>, vector<32x32xf32>, vector<1x32xf32> -> vector<1x32xf32>
    %c0_33 = arith.constant 0 : index
    %c0_34 = arith.constant 0 : index
    %61 = vector.load %arg6[%c0_33, %c0_34] : memref<32x32xf32, #tpu.memory_space<vmem>>, vector<32x32xf32>
    %cst_35 = arith.constant dense<0.000000e+00> : vector<1x32xf32>
    %62 = tpu.matmul %60, %61, %cst_35 {dimension_numbers = #tpu.dot_dimension_numbers<[1], [0], [0], [1], [0, 0, 1, 1], [], []>} : vector<1x32xf32>, vector<32x32xf32>, vector<1x32xf32> -> vector<1x32xf32>
    %c0_36 = arith.constant 0 : index
    %c0_37 = arith.constant 0 : index
    %63 = vector.load %arg9[%c0_36, %c0_37] : memref<1x32xf32, #tpu.memory_space<vmem>>, vector<1x32xf32>
    tpu.vector_store %arg9[%c0_36, %c0_37], %62 {strides = array<i32>} : memref<1x32xf32, #tpu.memory_space<vmem>>, vector<1x32xf32>,
    return
  }
}

</mosaic_0001>

<bundles_post_ra>
// kernel: tpu_custom_call.1
= control target key start
LH: loop header
LB: loop body
LE: loop exit
PB: predicated region body
PF: predicated region fallthrough
CT: control target
= control target key end

     0   :  { %14 = vsyncpa [#allocation4], 0  ;;  %s1415_s0 = inlined_call_operand.vmem [shape: s32[3], index: 0, kind: input, shape index: {}]   ;;  %s1416_s1 = inlined_call_operand.vmem [shape: f32[8,32], index: 1, kind: input, shape index: {}]   ;;  %s1417_s2 = inlined_call_operand.vmem [shape: f32[1,32], index: 2, kind: input, shape index: {}]   ;;  %s1418_s3 = inlined_call_operand.vmem [shape: f32[96,32], index: 3, kind: input, shape index: {}]   ;;  %s1419_s4 = inlined_call_operand.vmem [shape: f32[32,32], index: 4, kind: input, shape index: {}]   ;;  %s1420_s5 = inlined_call_operand.vmem [shape: f32[32,32], index: 5, kind: input, shape index: {}]   ;;  %s1421_s6 = inlined_call_operand.vmem [shape: f32[32,32], index: 6, kind: input, shape index: {}]   ;;  %s1422_s7 = inlined_call_operand.vmem [shape: f32[8,8], index: 7, kind: input, shape index: {}]   ;;  %s1423_s8 = inlined_call_operand.vmem [shape: f32[1,8], index: 8, kind: input, shape index: {}]   ;;  %s1424_s9 = inlined_call_operand.hbm [shape: f32[1,32], index: 9, kind: output, shape index: {}]  }
   0x1   :  { %15 = vsyncpa [#allocation3], 0  ;;  %s22_s11 = sshll.u32 %s1415_s0, 4  ;;  %s23_s11 = int_to_ptr.vmem [resolvable:$true] %s22_s11 }
   0x2   :  { %s1156_s12 = scalar_lea.vmem %s23_s11, 16  ;;  %p1161_p1 = scmp.lt.s32.totalorder %s23_s11, %s23_s11 }
   0x3   :  { %p1157_p0 = scmp.ne.s32.totalorder %s23_s11, %s1156_s12  ;;  %p1162_p2 = scmp.lt.s32.totalorder %s1156_s12, %s1156_s12 }
   0x5   :  { %p1163_p3 = por %p1162_p2, %p1161_p1 }
   0x7   :  { %p1164_p4 = pnand %p1163_p3, %p1157_p0 }
   0x9   :  { %1167 = shalt.err (!%p1164_p4)
}
   0xa   :  { %s1194_s13 = smov [#allocation2]  }
   0xb   :  { %25 = dma.vmem_to_smem %s23_s11, 16, %s1194_s13, [#allocation4]  }
   0xc   :  { %1190 = dma.done.wait [#allocation4], 16  }
   0xd   :  { %1191 = vsyncadd [#allocation4], 4294967280 }
   0xe   :  { %45 = sfence }
   0xf   :  { %v1255_v0 = vld [vmem:[%s1416_s1] sm:$0xff]  ;;  %s46_s16 = sld [smem:[#allocation2]]  ;;  %v50_v1 = vlaneseq  ;;  %v1195_v2 = vmov 0.0   ;;  %vm1196_vm0 = vmmov 0   ;;  %s954_s0 = sld [smem:[#allocation2 + $0x1]]  ;;  %v231_v5 = vld [vmem:[%s1418_s3 + $0x28] sm:$0xff] }
  0x10   :  { %1014 = vmatprep.subr.mxu0 %v1195_v2  ;;  %1016 = vmatprep.mubr.msk.f32.mxu0 %vm1196_vm0, %v1195_v2  ;;  %v230_v4 = vld [vmem:[%s1418_s3 + $0x20] sm:$0xff]  ;;  %v1197_v6 = vmov 0.0|0.0   ;;  %vm60_vm1 = vcmask 64512   ;;  %v232_v10 = vld [vmem:[%s1418_s3 + $0x30] sm:$0xff]  ;;  %v233_v11 = vld [vmem:[%s1418_s3 + $0x38] sm:$0xff]  ;;  %vm207_vm4 = vcmask 261120  }
  0x11   :  { %1015 = vmatpush3.msra.mxu0 %v1255_v0  ;;  %1019 = vmatprep.subr.mxu1 %v1195_v2  ;;  %v51_v3 = vand.u32 127, %v50_v1  ;;  %v1106_v8 = vpack.c.bf16 %v231_v5, %v230_v4  ;;  %v1109_v14 = vpack.c.bf16 %v233_v11, %v232_v10  ;;  %v458_v15 = vld [vmem:[%s1419_s4] sm:$0xff]  ;;  %v459_v16 = vld [vmem:[%s1419_s4 + $0x8] sm:$0xff]  ;;  %vm1125_vm5 = vmpackc.low %vm207_vm4, %vm207_vm4  ;;  %v208_v21 = vsel %vm207_vm4, %v1255_v0, 0.0  ;;  %s955_s11 = sld [smem:[#allocation2 + $0x2]]  ;;  %s1198_s21 = smov [#allocation5]  }
  0x12   :  { %1020 = vmatpush3.msra.mxu1 %v1255_v0  ;;  %1021 = vmatprep.mubr.msk.f32.mxu1 %vm1196_vm0, %v1195_v2  ;;  %v1124_v17 = vpack.c.bf16 %v459_v16, %v458_v15  ;;  %v460_v18 = vld [vmem:[%s1419_s4 + $0x10] sm:$0xff]  ;;  %v461_v19 = vld [vmem:[%s1419_s4 + $0x18] sm:$0xff]  ;;  %v209_v22 = vrot.slane %v208_v21, 4  ;;  %v226_v28 = vld [vmem:[%s1418_s3] sm:$0xff]  ;;  %vm698_vm6 = vcmask 57344   ;;  %vm937_vm7 = vcmask 253952  }
  0x13   :  { %1105 = vmatprep.subr.bf16.mxu0 %v1197_v6  ;;  %1123 = vmatprep.subr.bf16.mxu1 %v1197_v6  ;;  %v1128_v20 = vpack.c.bf16 %v461_v19, %v460_v18  ;;  %v227_v29 = vld [vmem:[%s1418_s3 + $0x8] sm:$0xff]  ;;  %v219_v32 = vld [vmem:[%s1417_s2] sm:$0x1]  ;;  %v228_v35 = vld [vmem:[%s1418_s3 + $0x10] sm:$0xff]  ;;  %s945_s2 = sshll.u32 %s1198_s21, 4  ;;  %s946_s2 = int_to_ptr.vmem [resolvable:$true] %s945_s2 }
  0x14   :  { %v210_v23 = vadd.f32 %v209_v22, %v208_v21  ;;  %v1112_v31 = vpack.c.bf16 %v227_v29, %v226_v28  ;;  %v229_v36 = vld [vmem:[%s1418_s3 + $0x18] sm:$0xff]  ;;  %v380_v44 = vld [vmem:[%s1418_s3 + $0x40] sm:$0xff]  ;;  %v381_v45 = vld [vmem:[%s1418_s3 + $0x48] sm:$0xff]  ;;  %s1172_s22 = scalar_lea.vmem %s946_s2, 32  ;;  %p1173_p7 = scmp.lt.s32.totalorder %s946_s2, %s946_s2 }
  0x15   :  { %v52_v7 = vstv %s46_s16  ;;  %v56_v9 = vstv %s954_s0  ;;  %v1115_v42 = vpack.c.bf16 %v229_v36, %v228_v35  ;;  %v1118_v47 = vpack.c.bf16 %v381_v45, %v380_v44  ;;  %v382_v48 = vld [vmem:[%s1418_s3 + $0x50] sm:$0xff]  ;;  %v383_v49 = vld [vmem:[%s1418_s3 + $0x58] sm:$0xff] }
  0x16   :  { %vm53_vm2 = vcmp.eq.s32.totalorder %v51_v3, %v52_v7  ;;  %vm57_vm3 = vcmp.eq.s32.totalorder %v51_v3, %v56_v9  ;;  %v211_v24 = vrot.slane %v210_v23, 2  ;;  %v1121_v50 = vpack.c.bf16 %v383_v49, %v382_v48  ;;  %v624_v53 = vld [vmem:[%s1422_s7] sm:$0xff]  ;;  %v784_v9 = vld [vmem:[%s1420_s5 + $0x8] sm:$0xff]  ;;  %v785_v10 = vld [vmem:[%s1420_s5 + $0x10] sm:$0xff] }
  0x17   :  { %v956_v12 = vsel %vm53_vm2, 1.0, %v1195_v2  ;;  %v1282_v13 = vsel %vm57_vm3, 1.0, %v1195_v2  ;;  %p216_p5 = scmp.ne.s32.totalorder %s955_s11, 0  ;;  %v695_v58 = vld [vmem:[%s1423_s8] sm:$0x1]  ;;  %v861_v18 = vld [vmem:[%s1421_s6 + $0x8] sm:$0xff] }
  0x18   :  { %1017 = vmatmul.mubr.msk.f32.vlgmr.msra.gmra.mrb[0].mxu0 %vm60_vm1, %v956_v12  ;;  %1022 = vmatmul.mubr.msk.f32.vlgmr.msra.gmra.mrb[0].mxu1 %vm60_vm1, %v1282_v13  ;;  %v212_v25 = vadd.f32 %v211_v24, %v210_v23  ;;  %v786_v12 = vld [vmem:[%s1420_s5 + $0x18] sm:$0xff]  ;;  %v862_v19 = vld [vmem:[%s1421_s6 + $0x10] sm:$0xff] }
  0x19   :  { %1107 = vmatpush3.bf16.msra.mxu0 %v1106_v8  ;;  %1032 = vmatprep.mubr.msk.f32.mxu0 %vm1196_vm0, %v1195_v2  ;;  %s217_s12 = scalar_select %p216_p5, 1, 0  ;;  %v783_v8 = vld [vmem:[%s1420_s5] sm:$0xff]  ;;  %v863_v21 = vld [vmem:[%s1421_s6 + $0x18] sm:$0xff] }
  0x1a   :  { %1108 = vmatprep.subr.bf16.mxu0 %v1197_v6  ;;  %1065 = vmatprep.mubr.msk.f32.mxu1 %vm1196_vm0, %v1195_v2  ;;  %v213_v26 = vrot.slane %v212_v25, 1  ;;  %v1132_v11 = vpack.c.bf16 %v784_v9, %v783_v8  ;;  %v1141_v22 = vpack.c.bf16 %v863_v21, %v862_v19 }
  0x1b   :  { %1126 = vmatpush3.bf16.xpose.msk.msra.mxu1 %vm1125_vm5, %v1124_v17  ;;  %s218_s13 = scvt.s32.f32 %s217_s12  ;;  %v860_v17 = vld [vmem:[%s1421_s6] sm:$0xff]  ;;  %s1168_s6 = scalar_lea.vmem %s946_s2, 16 }
  0x1c   :  { %1127 = vmatprep.subr.bf16.mxu1 %v1197_v6  ;;  %v214_v27 = vadd.f32 %v213_v26, %v212_v25  ;;  %p1169_p6 = scmp.ne.s32.totalorder %s946_s2, %s1168_s6  ;;  %p1174_p8 = scmp.lt.s32.totalorder %s1172_s22, %s1168_s6 }
  0x1d   :  { %1110 = vmatpush3.bf16.msra.mxu0 %v1109_v14  ;;  %s222_s14 = ssub.f32 1.0, %s218_s13  ;;  %v220_v33 = vstv %s218_s13 }
  0x1e   :  { %1111 = vmatprep.subr.bf16.mxu0 %v1197_v6  ;;  %v215_v30 = vmul.f32 0.125, %v214_v27  ;;  %v221_v39 = vmul.f32 %v220_v33, %v219_v32  ;;  %p1175_p9 = por %p1174_p8, %p1173_p7 }
  0x1f   :  { %v223_v34 = vstv %s222_s14 }
  0x20   :  { %v224_v40 = vmul.f32 %v223_v34, %v215_v30  ;;  %p1176_p10 = pnand %p1175_p9, %p1169_p6 }
  0x22   :  { %v225_v46 = vadd.f32 %v224_v40, %v221_v39 }
  0x23   :  { %1130 = vmatpush3.bf16.xpose.msk.msra.mxu1 %vm1125_vm5, %v1128_v20  ;;  %v1138_v20 = vpack.c.bf16 %v861_v18, %v860_v17 }
  0x24   :  { %1068 = vmatprep.subr.mxu1 %v1195_v2 }
  0xeb   :  { %v130_v37 = vpop.f32.mrb[0].mxu0  ;;  %v203_v41 = vpop.f32.mrb[0].mxu1 }
  0xec   :  { %v1018_v38 = vpop.f32.mrb[1].mxu0  ;;  %1033 = vmatmul.mubr.msk.f32.vlgmr.msra.gmra.mrb[2].mxu0 %vm207_vm4, %v130_v37  ;;  %v1023_v43 = vpop.f32.mrb[1].mxu1 }
  0xed   :  { %1113 = vmatpush3.bf16.msra.mxu0 %v1112_v31  ;;  %1043 = vmatprep.mubr.msk.f32.mxu0 %vm1196_vm0, %v1195_v2 }
  0xee   :  { %1114 = vmatprep.subr.bf16.mxu0 %v1197_v6 }
  0xf1   :  { %1116 = vmatpush3.bf16.msra.mxu0 %v1115_v42 }
  0xf2   :  { %1117 = vmatprep.subr.bf16.mxu0 %v1197_v6 }
  0xf4   :  { %1044 = vmatmul.mubr.msk.f32.vlgmr.msra.gmra.mrb[2].mxu0 %vm207_vm4, %v225_v46 }
  0xf5   :  { %1119 = vmatpush3.bf16.msra.mxu0 %v1118_v47  ;;  %1054 = vmatprep.mubr.msk.f32.mxu0 %vm1196_vm0, %v1195_v2 }
  0xf6   :  { %1120 = vmatprep.subr.bf16.mxu0 %v1197_v6 }
  0xf9   :  { %1122 = vmatpush3.bf16.msra.mxu0 %v1121_v50 }
  0xfa   :  { %1078 = vmatprep.subr.mxu0 %v1195_v2 }
  0xfc   :  { %1055 = vmatmul.mubr.msk.f32.vlgmr.msra.gmra.mrb[2].mxu0 %vm207_vm4, %v203_v41 }
  0xfd   :  { %1079 = vmatpush3.msra.mxu0 %v1255_v0  ;;  %1080 = vmatprep.mubr.msk.f32.mxu0 %vm1196_vm0, %v1195_v2 }
  0xfe   :  { %1137 = vmatprep.subr.bf16.mxu0 %v1197_v6 }
 0x1cf   :  { %v453_v51 = vpop.f32.mrb[2].mxu0 }
 0x1d0   :  { %v1056_v52 = vpop.f32.mrb[3].mxu0  ;;  %1066 = vmatmul.mubr.msk.f32.vlgmr.msra.gmra.mrb[2].mxu1 %vm207_vm4, %v453_v51 }
 0x1d1   :  { %1069 = vmatpush3.xpose.msk.msra.mxu1 %vm207_vm4, %v1255_v0  ;;  %1070 = vmatprep.mubr.msk.f32.mxu1 %vm1196_vm0, %v1195_v2 }
 0x1d2   :  { %1073 = vmatprep.subr.mxu1 %v1195_v2 }
 0x2a3   :  { %v543_v54 = vpop.f32.mrb[2].mxu1 }
 0x2a4   :  { %v1067_v55 = vpop.f32.mrb[3].mxu1  ;;  %1071 = vmatmul.mubr.msk.f32.vlgmr.msra.gmra.mrb[4].mxu1 %vm207_vm4, %v543_v54 }
 0x2a5   :  { %1074 = vmatpush3.msra.mxu1 %v624_v53  ;;  %1075 = vmatprep.mubr.msk.f32.mxu1 %vm1196_vm0, %v1195_v2 }
 0x2a6   :  { %1131 = vmatprep.subr.bf16.mxu1 %v1197_v6 }
 0x2a8   :  { %1076 = vmatmul.mubr.msk.f32.vlgmr.msra.gmra.mrb[6].mxu1 %vm60_vm1, %v1282_v13  ;;  %v1135_v13 = vpack.c.bf16 %v786_v12, %v785_v10 }
 0x2a9   :  { %1091 = vmatprep.mubr.msk.f32.mxu1 %vm1196_vm0, %v1195_v2  ;;  %1133 = vmatpush3.bf16.msra.mxu1 %v1132_v11 }
 0x2aa   :  { %1134 = vmatprep.subr.bf16.mxu1 %v1197_v6 }
 0x2ad   :  { %1136 = vmatpush3.bf16.msra.mxu1 %v1135_v13 }
 0x377   :  { %v619_v56 = vpop.f32.mrb[4].mxu1 }
 0x378   :  { %v1072_v57 = vpop.f32.mrb[5].mxu1  ;;  %v623_v60 = vmul.f32 0.17677669, %v619_v56 }
 0x37b   :  { %v691_v59 = vpop.f32.mrb[6].mxu1 }
 0x37c   :  { %v696_v61 = vadd.f32 %v695_v58, %v691_v59  ;;  %v1077_v62 = vpop.f32.mrb[7].mxu1 }
 0x37e   :  { %v697_v63 = vadd.f32 %v696_v61, %v623_v60 }
 0x380   :  { %v699_v0 = vsel %vm698_vm6, %v697_v63, -inf }
 0x381   :  { %700 = vmax.xlane.f32.xlu0 %v699_v0 }
 0x40e   :  { %v701_v1 = vpop.xlane.xlu0 %700 }
 0x40f   :  { %v702_v3 = vsub.f32 %v697_v63, %v701_v1 }
 0x411   :  { %v703_v4 = vmul.f32 1.442695, %v702_v3 }
 0x413   :  { %1152 = vpow2.f32 %v703_v4 }
 0x41d   :  { %v1153_v5 = vpop.eup %1152 }
 0x41e   :  { %v705_v7 = vsel %vm698_vm6, %v1153_v5, 0.0 }
 0x41f   :  { %706 = vadd.xlane.f32.xlu0 %v705_v7 }
 0x4ac   :  { %v707_v14 = vpop.xlane.xlu0 %706 }
 0x4ad   :  { %1154 = vrcp.f32 %v707_v14 }
 0x4b7   :  { %v1155_v15 = vpop.eup %1154 }
 0x4b8   :  { %v709_v16 = vmul.f32 %v1155_v15, %v1153_v5 }
 0x4ba   :  { %1081 = vmatmul.mubr.msk.f32.vlgmr.msra.gmra.mrb[4].mxu0 %vm60_vm1, %v709_v16 }
 0x4bb   :  { %1102 = vmatprep.mubr.msk.f32.mxu0 %vm1196_vm0, %v1195_v2  ;;  %1139 = vmatpush3.bf16.msra.mxu0 %v1138_v20 }
 0x4bc   :  { %1140 = vmatprep.subr.bf16.mxu0 %v1197_v6 }
 0x4bf   :  { %1142 = vmatpush3.bf16.msra.mxu0 %v1141_v22 }
 0x58d   :  { %v779_v2 = vpop.f32.mrb[4].mxu0 }
 0x58e   :  { %v1082_v23 = vpop.f32.mrb[5].mxu0  ;;  %1092 = vmatmul.mubr.msk.f32.vlgmr.msra.gmra.mrb[8].mxu1 %vm207_vm4, %v779_v2 }
 0x661   :  { %v856_v24 = vpop.f32.mrb[8].mxu1 }
 0x662   :  { %v1093_v25 = vpop.f32.mrb[9].mxu1  ;;  %1103 = vmatmul.mubr.msk.f32.vlgmr.msra.gmra.mrb[6].mxu0 %vm207_vm4, %v856_v24 }
 0x735   :  { %v933_v26 = vpop.f32.mrb[6].mxu0 }
 0x736   :  { %v1104_v27 = vpop.f32.mrb[7].mxu0  ;;  %938 = vst.msk [vmem:[#allocation5] sm:$0x1] %vm937_vm7, %v933_v26 }
 0x737   :  { %1179 = shalt.err (!%p1176_p10)
}
 0x738   :  { %s1180_s25 = scalar_lea.hbm %s1424_s9, 16 }
 0x739   :  { %p1181_p11 = scmp.ne.s32.totalorder %s1424_s9, %s1180_s25  ;;  %p1184_p12 = scmp.lt.u32.totalorder %s1180_s25, %s1424_s9 }
 0x73b   :  { %p1186_p13 = pnand %p1184_p12, %p1181_p11 }
 0x73d   :  { %1189 = shalt.err (!%p1186_p13)
}
 0x73e   :  { %948 = dma.vmem_to_hbm [thread:$0]  %s946_s2, 16, %s1424_s9, [#allocation3]  }
 0x73f   :  { %1192 = dma.done.wait [#allocation3], 16  }
 0x740   :  { %1193 = vsyncadd [#allocation3], 4294967280 }
 0x741   :  { %952 = vsyncpa [#allocation3], 1 }
 0x742   :  { %953 = vsyncpa [#allocation4], 1 }

</bundles_post_ra>
